<compile_context>
chip_gen: v7x
topology: tpu7x:2x2x1
jax: 0.10.0
libtpu: 0.0.40
codegen_flags: <defaults>
</compile_context>

<pallas_src>
import functools

import jax
import jax.numpy as jnp
import numpy as np
from jax.experimental import pallas as pl
from jax.experimental.pallas import tpu as pltpu


def _aspp_kernel(x_ref, m_ref, b_ref, o_ref, *, offsets, tile_h):
    """One batch element of the fused sum-of-dilated-convs.

    x_ref : (1, Hp, Wp*Cin)        lane-dense zero-padded input rows (compute dtype)
    m_ref : (n_off, Wp*Cin, WCo_p)  pre-packed block-banded weights (grid-resident)
    b_ref : (1, WCo_p)              summed bias, tiled to the output layout (f32)
    o_ref : (1, tile_h, WCo_p)      lane-dense output tile
    """
    wco = o_ref.shape[-1]
    acc = jnp.zeros((tile_h, wco), dtype=jnp.float32)

    # Static unrolled loop over the distinct kernel-row offsets. Each step is one MXU
    # matmul (tile_h x Wp*Cin) x (Wp*Cin x WCo_p); the LHS is a static ref-level row
    # slice so Mosaic only loads the shifted rows it needs (no full-tile relayout).
    for i, oh in enumerate(offsets):
        acc += jnp.dot(x_ref[0, oh:oh + tile_h, :], m_ref[i],
                       preferred_element_type=jnp.float32)

    o_ref[0] = (acc + b_ref[...]).astype(o_ref.dtype)


def _pack_weights(weights, biases, dilations, pad, W, Cin, compute_dtype):
    """Fold (branch, kh, kw, Cin->Cout) into a block-banded slab per kernel-row offset.

    out[h, w*Cout+co] = sum_oh sum_{wp,ci} x_pad[h+oh, wp*Cin+ci] * M[oh, wp*Cin+ci, w*Cout+co]

    In production (static weights) call this once and reuse the result across steps.
    """
    NB, Cout = weights.shape[0], weights.shape[1]
    Wp = W + 2 * pad
    offsets = sorted({pad + (kh - 1) * int(d) for d in dilations for kh in range(3)})
    oh_pos = {oh: i for i, oh in enumerate(offsets)}
    n_off = len(offsets)

    # Structural selection tensor, built once in numpy (no jnp.kron / scatter chains).
    # S[i, b, kh, kw, wp, w] = 1 iff offsets[i] == pad+(kh-1)*d_b and wp == w+pad+(kw-1)*d_b
    S = np.zeros((n_off, NB, 3, 3, Wp, W), dtype=np.float32)
    for bi, d in enumerate(dilations):
        d = int(d)
        for kh in range(3):
            i = oh_pos[pad + (kh - 1) * d]
            for kw in range(3):
                ow = pad + (kw - 1) * d
                S[i, bi, kh, kw, np.arange(W) + ow, np.arange(W)] = 1.0

    WCo = W * Cout
    WCo_pad = ((WCo + 127) // 128) * 128  # keep output stores unmasked / lane-dense

    # Single contraction: M[i, wp, ci, w, co] = sum_{b,kh,kw} S * weights[b, co, ci, kh, kw]
    M = jnp.einsum("ibhkpw,bochk->ipcwo",
                   jnp.asarray(S), weights.astype(jnp.float32))
    M = M.reshape(n_off, Wp * Cin, WCo)
    if WCo_pad != WCo:
        M = jnp.pad(M, ((0, 0), (0, 0), (0, WCo_pad - WCo)))
    M = M.astype(compute_dtype)

    # Branches are summed, so add the summed bias once, in the output layout (f32).
    bias_row = jnp.tile(jnp.sum(biases.astype(jnp.float32), axis=0), W)
    if WCo_pad != WCo:
        bias_row = jnp.pad(bias_row, (0, WCo_pad - WCo))
    bias_row = bias_row.reshape(1, WCo_pad)

    return M, bias_row, tuple(offsets), WCo_pad


def classifier_module_forward(x_nchw, weights, biases, dilations, paddings,
                              *, compute_dtype=jnp.bfloat16):
    """x_nchw: (N, Cin, H, W).  weights: (NB, Cout, Cin, 3, 3).  biases: (NB, Cout)."""
    assert tuple(int(d) for d in dilations) == tuple(int(p) for p in paddings), \
        "Classifier_Module assumes pad == dilation"
    N, Cin, H, W = x_nchw.shape
    Cout = weights.shape[1]
    pad = max(int(d) for d in dilations)
    Hp, Wp = H + 2 * pad, W + 2 * pad

    # Whole height per grid step (collapse the old T axis); grid=(N,) keeps >=2 parallel
    # steps for v7x's two TensorCores while removing the per-step overhead of tiny tiles.
    tile_h = H

    M, bias_row, offsets, WCo_pad = _pack_weights(
        weights, biases, dilations, pad, W, Cin, compute_dtype)

    # Input: NCHW -> NHWC -> zero-pad -> pack channels onto the lane axis.  No halo
    # duplication: every kernel slice of the (Hp, Wp*Cin) slab is a static row window.
    x_nhwc = jnp.transpose(x_nchw, (0, 2, 3, 1))
    x_pad = jnp.pad(x_nhwc, ((0, 0), (pad, pad), (pad, pad), (0, 0)))
    x2 = x_pad.reshape(N, Hp, Wp * Cin).astype(compute_dtype)

    kernel = functools.partial(_aspp_kernel, offsets=offsets, tile_h=tile_h)

    out2 = pl.pallas_call(
        kernel,
        out_shape=jax.ShapeDtypeStruct((N, H, WCo_pad), x_nchw.dtype),
        grid=(N,),
        in_specs=[
            pl.BlockSpec((1, Hp, Wp * Cin), lambda n: (n, 0, 0)),
            pl.BlockSpec((len(offsets), Wp * Cin, WCo_pad), lambda n: (0, 0, 0)),
            pl.BlockSpec((1, WCo_pad), lambda n: (0, 0)),
        ],
        out_specs=pl.BlockSpec((1, tile_h, WCo_pad), lambda n: (n, 0, 0)),
        compiler_params=pltpu.CompilerParams(
            dimension_semantics=("parallel",),
            vmem_limit_bytes=32 * 1024 * 1024,   # v5e scoped default is only 16 MiB
        ),
    )(x2, M, bias_row)

    out2 = out2[..., :W * Cout]
    # TODO(synk): keep the NHWC/(N, H, W*Cout) layout if the consumer allows, to skip
    # this final relayout; NCHW is kept here to match the PyTorch module's convention.
    return jnp.transpose(out2.reshape(N, H, W, Cout), (0, 3, 1, 2))


def _reference(x_nchw, weights, biases, dilations, paddings):
    """Pure-JAX reference using lax.conv_general_dilated (NCHW, like PyTorch)."""
    out = None
    for i, (d, p) in enumerate(zip(dilations, paddings)):
        y = jax.lax.conv_general_dilated(
            x_nchw, weights[i],
            window_strides=(1, 1),
            padding=((p, p), (p, p)),
            rhs_dilation=(d, d),
            dimension_numbers=("NCHW", "OIHW", "NCHW"),
        ) + biases[i][None, :, None, None]
        out = y if out is None else out + y
    return out


if __name__ == "__main__":
    # Small synthetic config consistent with Classifier_Module:
    #   dilation_series = padding_series = [1, 2, 3], NoLabels = 8, input_channel = 4
    dilation_series = [1, 2, 3]
    padding_series = [1, 2, 3]
    NoLabels = 8
    input_channel = 4
    N, H, W = 2, 16, 16

    key = jax.random.PRNGKey(0)
    kx, kw, kb = jax.random.split(key, 3)

    x = jax.random.normal(kx, (N, input_channel, H, W), dtype=jnp.float32)
    # weight.data.normal_(0, 0.01) per branch; deterministic synthetic init
    weights = 0.01 * jax.random.normal(
        kw, (len(dilation_series), NoLabels, input_channel, 3, 3), dtype=jnp.float32)
    # Conv2d default bias init is uniform(-1/sqrt(fan_in), 1/sqrt(fan_in)); synthetic here
    bound = 1.0 / float(np.sqrt(input_channel * 9))
    biases = jax.random.uniform(
        kb, (len(dilation_series), NoLabels), dtype=jnp.float32, minval=-bound, maxval=bound)

    ref = _reference(x, weights, biases, dilation_series, padding_series)

    # Strict check of the kernel/packing logic with f32 operands.
    out_f32 = classifier_module_forward(
        x, weights, biases, dilation_series, padding_series, compute_dtype=jnp.float32)
    out_f32 = jax.block_until_ready(out_f32)
    assert out_f32.shape == (N, NoLabels, H, W)
    assert jnp.allclose(out_f32, ref, atol=1e-4, rtol=1e-4), "f32 mismatch vs reference conv"

    # Default perf configuration: bf16 operands (halves the dominant HBM transfer, native
    # MXU rate on v6e/v7x) with f32 accumulation; bf16-appropriate tolerance.
    out = classifier_module_forward(x, weights, biases, dilation_series, padding_series)
    out = jax.block_until_ready(out)
    assert out.shape == (N, NoLabels, H, W)
    assert jnp.allclose(out, ref, atol=5e-3, rtol=5e-2), "bf16 mismatch vs reference conv"

    print("KERNEL_OK")
</pallas_src>

<mosaic_0001>
module attributes {stable_mosaic.version = 11 : i64} {
  func.func @_aspp_kernel(%arg0: i32, %arg1: memref<1x22x88xf32, #tpu.memory_space<vmem>>, %arg2: memref<7x88x128xf32, #tpu.memory_space<vmem>>, %arg3: memref<1x128xf32, #tpu.memory_space<vmem>>, %arg4: memref<1x16x128xf32, #tpu.memory_space<vmem>>) attributes {dimension_semantics = [#tpu.dimension_semantics<parallel>], iteration_bounds = array<i64: 2>, scalar_prefetch = 0 : i64, scratch_operands = 0 : i64, tpu.core_type = #tpu.core_type<tc>, window_params = [{transform_indices = @transform_0, window_bounds = array<i64: 1, 22, 88>}, {pipeline_mode = #tpu.pipeline_mode<synchronous>, transform_indices = @transform_1, window_bounds = array<i64: 7, 88, 128>}, {pipeline_mode = #tpu.pipeline_mode<synchronous>, transform_indices = @transform_2, window_bounds = array<i64: 1, 128>}, {transform_indices = @transform_3, window_bounds = array<i64: 1, 16, 128>}]} {
    %cst = arith.constant 0.000000e+00 : f32
    %0 = vector.broadcast %cst : f32 to vector<16x128xf32>
    %c0 = arith.constant 0 : index
    %c0_0 = arith.constant 0 : index
    %c0_1 = arith.constant 0 : index
    %1 = vector.load %arg1[%c0, %c0_0, %c0_1] : memref<1x22x88xf32, #tpu.memory_space<vmem>>, vector<1x16x88xf32>
    %2 = vector.shape_cast %1 : vector<1x16x88xf32> to vector<16x88xf32>
    %c0_2 = arith.constant 0 : index
    %c0_3 = arith.constant 0 : index
    %c0_4 = arith.constant 0 : index
    %3 = vector.load %arg2[%c0_2, %c0_3, %c0_4] : memref<7x88x128xf32, #tpu.memory_space<vmem>>, vector<1x88x128xf32>
    %4 = vector.shape_cast %3 : vector<1x88x128xf32> to vector<88x128xf32>
    %cst_5 = arith.constant dense<0.000000e+00> : vector<16x128xf32>
    %5 = tpu.matmul %2, %4, %cst_5 {dimension_numbers = #tpu.dot_dimension_numbers<[1], [0], [0], [1], [0, 0, 1, 1], [], []>} : vector<16x88xf32>, vector<88x128xf32>, vector<16x128xf32> -> vector<16x128xf32>
    %6 = arith.addf %0, %5 : vector<16x128xf32>
    %c0_6 = arith.constant 0 : index
    %c1 = arith.constant 1 : index
    %c0_7 = arith.constant 0 : index
    %7 = vector.load %arg1[%c0_6, %c1, %c0_7] : memref<1x22x88xf32, #tpu.memory_space<vmem>>, vector<1x16x88xf32>
    %8 = vector.shape_cast %7 : vector<1x16x88xf32> to vector<16x88xf32>
    %c1_8 = arith.constant 1 : index
    %c0_9 = arith.constant 0 : index
    %c0_10 = arith.constant 0 : index
    %9 = vector.load %arg2[%c1_8, %c0_9, %c0_10] : memref<7x88x128xf32, #tpu.memory_space<vmem>>, vector<1x88x128xf32>
    %10 = vector.shape_cast %9 : vector<1x88x128xf32> to vector<88x128xf32>
    %cst_11 = arith.constant dense<0.000000e+00> : vector<16x128xf32>
    %11 = tpu.matmul %8, %10, %cst_11 {dimension_numbers = #tpu.dot_dimension_numbers<[1], [0], [0], [1], [0, 0, 1, 1], [], []>} : vector<16x88xf32>, vector<88x128xf32>, vector<16x128xf32> -> vector<16x128xf32>
    %12 = arith.addf %6, %11 : vector<16x128xf32>
    %c0_12 = arith.constant 0 : index
    %c2 = arith.constant 2 : index
    %c0_13 = arith.constant 0 : index
    %13 = vector.load %arg1[%c0_12, %c2, %c0_13] : memref<1x22x88xf32, #tpu.memory_space<vmem>>, vector<1x16x88xf32>
    %14 = vector.shape_cast %13 : vector<1x16x88xf32> to vector<16x88xf32>
    %c2_14 = arith.constant 2 : index
    %c0_15 = arith.constant 0 : index
    %c0_16 = arith.constant 0 : index
    %15 = vector.load %arg2[%c2_14, %c0_15, %c0_16] : memref<7x88x128xf32, #tpu.memory_space<vmem>>, vector<1x88x128xf32>
    %16 = vector.shape_cast %15 : vector<1x88x128xf32> to vector<88x128xf32>
    %cst_17 = arith.constant dense<0.000000e+00> : vector<16x128xf32>
    %17 = tpu.matmul %14, %16, %cst_17 {dimension_numbers = #tpu.dot_dimension_numbers<[1], [0], [0], [1], [0, 0, 1, 1], [], []>} : vector<16x88xf32>, vector<88x128xf32>, vector<16x128xf32> -> vector<16x128xf32>
    %18 = arith.addf %12, %17 : vector<16x128xf32>
    %c0_18 = arith.constant 0 : index
    %c3 = arith.constant 3 : index
    %c0_19 = arith.constant 0 : index
    %19 = vector.load %arg1[%c0_18, %c3, %c0_19] : memref<1x22x88xf32, #tpu.memory_space<vmem>>, vector<1x16x88xf32>
    %20 = vector.shape_cast %19 : vector<1x16x88xf32> to vector<16x88xf32>
    %c3_20 = arith.constant 3 : index
    %c0_21 = arith.constant 0 : index
    %c0_22 = arith.constant 0 : index
    %21 = vector.load %arg2[%c3_20, %c0_21, %c0_22] : memref<7x88x128xf32, #tpu.memory_space<vmem>>, vector<1x88x128xf32>
    %22 = vector.shape_cast %21 : vector<1x88x128xf32> to vector<88x128xf32>
    %cst_23 = arith.constant dense<0.000000e+00> : vector<16x128xf32>
    %23 = tpu.matmul %20, %22, %cst_23 {dimension_numbers = #tpu.dot_dimension_numbers<[1], [0], [0], [1], [0, 0, 1, 1], [], []>} : vector<16x88xf32>, vector<88x128xf32>, vector<16x128xf32> -> vector<16x128xf32>
    %24 = arith.addf %18, %23 : vector<16x128xf32>
    %c0_24 = arith.constant 0 : index
    %c4 = arith.constant 4 : index
    %c0_25 = arith.constant 0 : index
    %25 = vector.load %arg1[%c0_24, %c4, %c0_25] : memref<1x22x88xf32, #tpu.memory_space<vmem>>, vector<1x16x88xf32>
    %26 = vector.shape_cast %25 : vector<1x16x88xf32> to vector<16x88xf32>
    %c4_26 = arith.constant 4 : index
    %c0_27 = arith.constant 0 : index
    %c0_28 = arith.constant 0 : index
    %27 = vector.load %arg2[%c4_26, %c0_27, %c0_28] : memref<7x88x128xf32, #tpu.memory_space<vmem>>, vector<1x88x128xf32>
    %28 = vector.shape_cast %27 : vector<1x88x128xf32> to vector<88x128xf32>
    %cst_29 = arith.constant dense<0.000000e+00> : vector<16x128xf32>
    %29 = tpu.matmul %26, %28, %cst_29 {dimension_numbers = #tpu.dot_dimension_numbers<[1], [0], [0], [1], [0, 0, 1, 1], [], []>} : vector<16x88xf32>, vector<88x128xf32>, vector<16x128xf32> -> vector<16x128xf32>
    %30 = arith.addf %24, %29 : vector<16x128xf32>
    %c0_30 = arith.constant 0 : index
    %c5 = arith.constant 5 : index
    %c0_31 = arith.constant 0 : index
    %31 = vector.load %arg1[%c0_30, %c5, %c0_31] : memref<1x22x88xf32, #tpu.memory_space<vmem>>, vector<1x16x88xf32>
    %32 = vector.shape_cast %31 : vector<1x16x88xf32> to vector<16x88xf32>
    %c5_32 = arith.constant 5 : index
    %c0_33 = arith.constant 0 : index
    %c0_34 = arith.constant 0 : index
    %33 = vector.load %arg2[%c5_32, %c0_33, %c0_34] : memref<7x88x128xf32, #tpu.memory_space<vmem>>, vector<1x88x128xf32>
    %34 = vector.shape_cast %33 : vector<1x88x128xf32> to vector<88x128xf32>
    %cst_35 = arith.constant dense<0.000000e+00> : vector<16x128xf32>
    %35 = tpu.matmul %32, %34, %cst_35 {dimension_numbers = #tpu.dot_dimension_numbers<[1], [0], [0], [1], [0, 0, 1, 1], [], []>} : vector<16x88xf32>, vector<88x128xf32>, vector<16x128xf32> -> vector<16x128xf32>
    %36 = arith.addf %30, %35 : vector<16x128xf32>
    %c0_36 = arith.constant 0 : index
    %c6 = arith.constant 6 : index
    %c0_37 = arith.constant 0 : index
    %37 = vector.load %arg1[%c0_36, %c6, %c0_37] : memref<1x22x88xf32, #tpu.memory_space<vmem>>, vector<1x16x88xf32>
    %38 = vector.shape_cast %37 : vector<1x16x88xf32> to vector<16x88xf32>
    %c6_38 = arith.constant 6 : index
    %c0_39 = arith.constant 0 : index
    %c0_40 = arith.constant 0 : index
    %39 = vector.load %arg2[%c6_38, %c0_39, %c0_40] : memref<7x88x128xf32, #tpu.memory_space<vmem>>, vector<1x88x128xf32>
    %40 = vector.shape_cast %39 : vector<1x88x128xf32> to vector<88x128xf32>
    %cst_41 = arith.constant dense<0.000000e+00> : vector<16x128xf32>
    %41 = tpu.matmul %38, %40, %cst_41 {dimension_numbers = #tpu.dot_dimension_numbers<[1], [0], [0], [1], [0, 0, 1, 1], [], []>} : vector<16x88xf32>, vector<88x128xf32>, vector<16x128xf32> -> vector<16x128xf32>
    %42 = arith.addf %36, %41 : vector<16x128xf32>
    %c0_42 = arith.constant 0 : index
    %c0_43 = arith.constant 0 : index
    %43 = vector.load %arg3[%c0_42, %c0_43] : memref<1x128xf32, #tpu.memory_space<vmem>>, vector<1x128xf32>
    %44 = vector.broadcast %43 : vector<1x128xf32> to vector<16x128xf32>
    %45 = arith.addf %42, %44 : vector<16x128xf32>
    %c0_44 = arith.constant 0 : index
    %c0_45 = arith.constant 0 : index
    %c0_46 = arith.constant 0 : index
    %46 = vector.load %arg4[%c0_44, %c0_45, %c0_46] : memref<1x16x128xf32, #tpu.memory_space<vmem>>, vector<1x16x128xf32>
    %47 = vector.shape_cast %46 : vector<1x16x128xf32> to vector<16x128xf32>
    %48 = vector.shape_cast %45 : vector<16x128xf32> to vector<1x16x128xf32>
    tpu.vector_store %arg4[%c0_44, %c0_45, %c0_46], %48 {strides = array<i32>} : memref<1x16x128xf32, #tpu.memory_space<vmem>>, vector<1x16x128xf32>,
    return
  }
  func.func @transform_0(%arg0: i32) -> (i32, i32, i32) {
    %c0_i32 = arith.constant 0 : i32
    %c0_i32_0 = arith.constant 0 : i32
    %c0_i32_1 = arith.constant 0 : i32
    return %arg0, %c0_i32, %c0_i32_0 : i32, i32, i32
  }
  func.func @transform_1(%arg0: i32) -> (i32, i32, i32) {
    %c0_i32 = arith.constant 0 : i32
    %c0_i32_0 = arith.constant 0 : i32
    %c0_i32_1 = arith.constant 0 : i32
    %c0_i32_2 = arith.constant 0 : i32
    return %c0_i32, %c0_i32_0, %c0_i32_1 : i32, i32, i32
  }
  func.func @transform_2(%arg0: i32) -> (i32, i32) {
    %c0_i32 = arith.constant 0 : i32
    %c0_i32_0 = arith.constant 0 : i32
    %c0_i32_1 = arith.constant 0 : i32
    return %c0_i32, %c0_i32_0 : i32, i32
  }
  func.func @transform_3(%arg0: i32) -> (i32, i32, i32) {
    %c0_i32 = arith.constant 0 : i32
    %c0_i32_0 = arith.constant 0 : i32
    %c0_i32_1 = arith.constant 0 : i32
    return %arg0, %c0_i32, %c0_i32_0 : i32, i32, i32
  }
}

</mosaic_0001>

<bundles_post_ra>
// kernel: tpu_custom_call.1
= control target key start
LH: loop header
LB: loop body
LE: loop exit
PB: predicated region body
PF: predicated region fallthrough
CT: control target
= control target key end

     0   :  { %8 = vsyncpa [#allocation3], 0  ;;  %s1753_s0 = inlined_call_operand.vmem [shape: f32[2,22,88], index: 0, kind: input, shape index: {}]   ;;  %s1754_s1 = inlined_call_operand.hbm [shape: f32[7,88,128], index: 1, kind: input, shape index: {}]   ;;  %s1755_s2 = inlined_call_operand.vmem [shape: f32[1,128], index: 2, kind: input, shape index: {}]   ;;  %s1756_s3 = inlined_call_operand.hbm [shape: f32[2,16,128], index: 3, kind: output, shape index: {}]  }
   0x1   :  { %9 = vsyncpa [#allocation4], 0 }
   0x2   :  { %11 = vsyncpa [#allocation4 + $0x1], 0  ;;  %s1582_s12 = smov 0   ;;  %s1584_s13 = smov 0  }
   0x3   :  { %s1586_s14 = smov 0   ;;  %s1588_s15 = smov 0  }
   0x4 LB: > { %s1603_s16 = sadd.s32 4294967295, %s1554_s15   ;;  %s958_s17 = sadd.s32 4294967294, %s1554_s15   ;;  %s1554_s15 = sphi %s1588_s15, %s1772_s15   ;;  %s1550_s14 = sphi %s1586_s14, %s1771_s14   ;;  %s1546_s13 = sphi %s1584_s13, %s1770_s13   ;;  %s1542_s12 = sphi %s1582_s12, %s1769_s12  }
   0x5   : > { %s1607_s18 = sadd.s32 1, %s1554_s15   ;;  %s92_s19 = sadd.s32 1, %s1550_s14 }
   0x6   : > { %s89_s20 = ssub.s32 %s1554_s15, %s1607_s18  ;;  %p102_p0 = scmp.ne.s32.totalorder %s1550_s14, %s1546_s13 }
   0x7   : > { %p90_p1 = scmp.eq.s32.totalorder %s89_s20, 0  ;;  %p103_p2 = scmp.eq.s32.totalorder %s1603_s16, 1 }
   0x8   : > { %p108_p3 = scmp.ne.s32.totalorder %s1546_s13, %s1542_s12  ;;  %p109_p4 = scmp.eq.s32.totalorder %s958_s17, 1 }
   0x9   : > { %s1618_s21 = scalar_select %p90_p1, %s1550_s14, %s92_s19  }
   0xa   : > { %p1620_p5 = por %p103_p2, %p102_p0  ;;  %p1624_p6 = por %p109_p4, %p108_p3 }
   0xb   : > { %p959_p7 = scmp.ge.s32.totalorder %s1554_s15, 1  ;;  %p116_p8 = scmp.lt.s32.totalorder %s1554_s15, 3 }
   0xc   : > { %s1760_s22 = scalar_select %p1620_p5, 1, 0 }
   0xd   : > { %s1761_s23 = scalar_select %p1624_p6, 1, 0 }
   0xe   : > { %p1757_p9 = scmp.eq.s32.totalorder %s1603_s16, 0  ;;  %p1631_p10 = pnand %p959_p7, %p116_p8 }
   0xf   : > { %s1556_s25 = smov [#allocation2]   ;;  %s1460_s30 = scalar_lea.hbm %s1754_s1, 9856 }
  0x10   : > { %s1762_s24 = scalar_select %p1631_p10, 1, 0 }
  0x11   : > { %s128_s26 = sshll.u32 %s1556_s25, 4  ;;  %p1412_p11 = pneg %p1631_p10  ;;  %s129_s26 = int_to_ptr.vmem [resolvable:$true] %s128_s26 }
  0x12   : > { %p1461_p13 = scmp.ne.s32.totalorder %s1754_s1, %s1460_s30  ;;  %p1467_p3 = scmp.lt.u32.totalorder %s1460_s30, %s1754_s1 }
  0x13   : > { %p1639_p12 = pnand %p1757_p9, %p1412_p11 }
  0x15   : > { %p1462_p0 = pneg %p1639_p12 }
  0x17   : > { %p1463_p1 = pnand %p1462_p0, %p1461_p13 }
  0x19   : > { %p1464_p2 = pneg %p1463_p1 }
  0x1b   : > { %p1469_p4 = pnand %p1467_p3, %p1464_p2 }
  0x1d   : > { %1472 = shalt.err (!%p1469_p4)
}
  0x1e   : > { %s1473_s8 = scalar_lea.vmem %s129_s26, 9856  ;;  %p1481_p9 = scmp.lt.s32.totalorder %s129_s26, %s129_s26 }
  0x1f   : > { %p1474_p7 = scmp.ne.s32.totalorder %s129_s26, %s1473_s8  ;;  %p1482_p6 = scmp.lt.s32.totalorder %s1473_s8, %s1473_s8 }
  0x21   : > { %p1476_p8 = pnand %p1474_p7, %p1462_p0  ;;  %p1483_p5 = por %p1482_p6, %p1481_p9 }
  0x23   : > { %p1477_p11 = pneg %p1476_p8 }
  0x25   : > { %p1484_p10 = pnand %p1483_p5, %p1477_p11 }
  0x27   : > { %1487 = shalt.err (!%p1484_p10)
}
  0x28   : > { %s1557_s9 = smov 128   ;;  %s1558_s10 = smov 8  }
  0x29   : > { %1415 = dma.hbm_to_vmem [thread:$0]  (!%p1639_p12), %s1754_s1, 9856, %s129_s26, [#allocation3], %s1557_s9, %s1557_s9, %s1558_s10  }
  0x2a   : > { %p1764_p13 = scmp.ne.s32.totalorder %s1762_s24, 0 }
  0x2b   : > { %p1765_p1 = scmp.eq.s32.totalorder (!%p1764_p13), %s1603_s16, 0 }
  0x2c   : > { %155 = sbr.rel (%p1764_p13) target bundleno = 378 (0x17a), region = 32 }
  0x33   : > { %1533 = dma.done.wait (%p1765_p1), [#allocation3], 9856   ;;  %p1766_p0 = pmov %p1765_p1 }
  0x34   : > { %p179_p5 = scmp.lt.s32.totalorder %s1603_s16, 1  ;;  %v200_v0 = vld [vmem:[#allocation2 + $0x58] sm:$0xff]  ;;  %v201_v1 = vld [vmem:[#allocation2 + $0x60] sm:$0xff]  ;;  %v474_v2 = vld [vmem:[#allocation2 + $0x108] sm:$0xff]  ;;  %vm211_vm0 = vcmask 719872   ;;  %s176_s27 = sand.u32 1, %s1546_s13  }
  0x35   : > { %1535 = vsyncadd (%p1766_p0), [#allocation3], 4294957440  ;;  %v1253_v3 = vpack.c.bf16 %v201_v1, %v200_v0  ;;  %v475_v4 = vld [vmem:[#allocation2 + $0x110] sm:$0xff]  ;;  %v202_v5 = vld [vmem:[#allocation2 + $0x68] sm:$0xff]  ;;  %s964_s28 = sshll.u32 %s176_s27, 4  ;;  %s986_s6 = sshll.u32 %s1603_s16, 8 }
  0x36   : > { %s180_s19 = scalar_select %p179_p5, %s1603_s16, 1  ;;  %v203_v6 = vld [vmem:[#allocation2 + $0x70] sm:$0xff]  ;;  %v1313_v7 = vpack.c.bf16 %v475_v4, %v474_v2  ;;  %v476_v9 = vld [vmem:[#allocation2 + $0x118] sm:$0xff]  ;;  %v477_v10 = vld [vmem:[#allocation2 + $0x120] sm:$0xff] }
  0x37   : > { %v1257_v8 = vpack.c.bf16 %v203_v6, %v202_v5  ;;  %v204_v11 = vld [vmem:[#allocation2 + $0x78] sm:$0xff]  ;;  %1254 = vmatprep.subr.bf16.mxu1 %v1253_v3  ;;  %v1317_v12 = vpack.c.bf16 %v477_v10, %v476_v9  ;;  %v205_v13 = vld [vmem:[#allocation2 + $0x80] sm:$0xff]  ;;  %v478_v14 = vld [vmem:[#allocation2 + $0x128] sm:$0xff]  ;;  %s178_s4 = scalar_lea.vmem [#allocation5], %s964_s28  ;;  %s1710_s9 = scalar_lea.hbm %s1756_s3, %s986_s6 }
  0x38   : > { %s1405_s20 = smul.u32 24, %s180_s19  ;;  %v479_v15 = vld [vmem:[#allocation2 + $0x130] sm:$0xff]  ;;  %1314 = vmatprep.subr.bf16.mxu0 %v1313_v7  ;;  %1256 = vmatpush3.bf16.msra.mxu1 %v1253_v3  ;;  %v1261_v16 = vpack.c.bf16 %v205_v13, %v204_v11  ;;  %v206_v18 = vld [vmem:[#allocation2 + $0x88] sm:$0xff]  ;;  %v480_v20 = vld [vmem:[#allocation2 + $0x138] sm:$0xff]  ;;  %s884_s5 = sshll.u32 %s178_s4, 4  ;;  %s1705_s5 = int_to_ptr.vmem [resolvable:$true] %s884_s5 }
  0x39   : > { %1316 = vmatpush3.bf16.msra.mxu0 %v1313_v7  ;;  %1258 = vmatprep.subr.bf16.mxu1 %v1257_v8  ;;  %v1321_v17 = vpack.c.bf16 %v479_v15, %v478_v14  ;;  %v207_v19 = vld [vmem:[#allocation2 + $0x90] sm:$0xff]  ;;  %v481_v21 = vld [vmem:[#allocation2 + $0x140] sm:$0xff]  ;;  %v208_v26 = vld [vmem:[#allocation2 + $0x98] sm:$0xff]  ;;  %s1712_s10 = scalar_lea.sflag [#allocation4], %s176_s27  ;;  %s1488_s16 = scalar_lea.vmem %s1705_s5, 256 }
  0x3a   : > { %s1670_s26 = scalar_lea.vmem %s1753_s0, %s1405_s20  ;;  %1318 = vmatprep.subr.bf16.mxu0 %v1317_v12  ;;  %v1265_v24 = vpack.c.bf16 %v207_v19, %v206_v18  ;;  %v1325_v25 = vpack.c.bf16 %v481_v21, %v480_v20  ;;  %v209_v27 = vld [vmem:[#allocation2 + $0xa0] sm:$0xff]  ;;  %v482_v28 = vld [vmem:[#allocation2 + $0x148] sm:$0xff]  ;;  %v483_v29 = vld [vmem:[#allocation2 + $0x150] sm:$0xff]  ;;  %p1489_p6 = scmp.ne.s32.totalorder %s1705_s5, %s1488_s16 }
  0x3b   : > { %v197_v22 = vld [vmem:[%s1670_s26 + $0x1] sm:$0xff]  ;;  %v1269_v30 = vpack.c.bf16 %v209_v27, %v208_v26  ;;  %v1329_v31 = vpack.c.bf16 %v483_v29, %v482_v28  ;;  %v210_v32 = vld [vmem:[#allocation2 + $0xa8] sm:$0xff]  ;;  %v186_v33 = vld [vmem:[#allocation2] sm:$0xff]  ;;  %p1767_p9 = scmp.ne.s32.totalorder %s1760_s22, 0  ;;  %s1559_s11 = smov [#allocation5]  }
  0x3c   : > { %1260 = vmatpush3.bf16.msra.mxu1 %v1257_v8  ;;  %1100 = vmatprep.mubr.msk.f32.mxu1 %vm211_vm0, %v197_v22  ;;  %v471_v23 = vld [vmem:[%s1670_s26 + $0x3] sm:$0xff]  ;;  %v187_v34 = vld [vmem:[#allocation2 + $0x8] sm:$0xff]  ;;  %v571_v36 = vld [vmem:[#allocation2 + $0x160] sm:$0xff]  ;;  %s1492_s17 = sshll.u32 %s1559_s11, 4  ;;  %s1493_s17 = int_to_ptr.vmem [resolvable:$false] %s1492_s17 }
  0x3d   : > { %1320 = vmatpush3.bf16.msra.mxu0 %v1317_v12  ;;  %1262 = vmatprep.subr.bf16.mxu1 %v1261_v16  ;;  %v484_v35 = vld [vmem:[#allocation2 + $0x158] sm:$0xff]  ;;  %v572_v37 = vld [vmem:[#allocation2 + $0x168] sm:$0xff]  ;;  %v1273_v38 = vpack.c.bf16 %v187_v34, %v186_v33  ;;  %v188_v39 = vld [vmem:[#allocation2 + $0x10] sm:$0xff]  ;;  %p1490_p10 = pnand %p1489_p6, %p1767_p9  ;;  %s1494_s19 = scalar_lea.vmem %s1493_s17, 512 }
  0x3e   : > { %1322 = vmatprep.subr.bf16.mxu0 %v1321_v17  ;;  %1175 = vmatprep.mubr.msk.f32.mxu0 %vm211_vm0, %v471_v23  ;;  %v189_v40 = vld [vmem:[#allocation2 + $0x18] sm:$0xff]  ;;  %v1333_v41 = vpack.c.bf16 %v572_v37, %v571_v36  ;;  %v573_v42 = vld [vmem:[#allocation2 + $0x170] sm:$0xff]  ;;  %v190_v48 = vld [vmem:[#allocation2 + $0x20] sm:$0xff]  ;;  %p1495_p2 = scmp.lt.s32.totalorder %s1705_s5, %s1493_s17  ;;  %p1496_p3 = scmp.lt.s32.totalorder %s1494_s19, %s1488_s16 }
  0x3f   : > { %v574_v43 = vld [vmem:[#allocation2 + $0x178] sm:$0xff]  ;;  %v1277_v46 = vpack.c.bf16 %v189_v40, %v188_v39  ;;  %v191_v49 = vld [vmem:[#allocation2 + $0x28] sm:$0xff]  ;;  %v575_v50 = vld [vmem:[#allocation2 + $0x180] sm:$0xff]  ;;  %p1491_p12 = pneg %p1490_p10 }
  0x40   : > { %1264 = vmatpush3.bf16.msra.mxu1 %v1261_v16  ;;  %v198_v44 = vld [vmem:[%s1670_s26 + $0x9] sm:$0xff]  ;;  %v1337_v47 = vpack.c.bf16 %v574_v43, %v573_v42  ;;  %v576_v51 = vld [vmem:[#allocation2 + $0x188] sm:$0xff]  ;;  %v184_v52 = vld [vmem:[%s1670_s26] sm:$0xff]  ;;  %v1281_v54 = vpack.c.bf16 %v191_v49, %v190_v48  ;;  %p1497_p4 = por %p1496_p3, %p1495_p2 }
  0x41   : > { %1324 = vmatpush3.bf16.msra.mxu0 %v1321_v17  ;;  %1266 = vmatprep.subr.bf16.mxu1 %v1265_v24  ;;  %v472_v45 = vld [vmem:[%s1670_s26 + $0xb] sm:$0xff]  ;;  %v1341_v55 = vpack.c.bf16 %v576_v51, %v575_v50  ;;  %v192_v56 = vld [vmem:[#allocation2 + $0x30] sm:$0xff]  ;;  %v195_v63 = vld [vmem:[#allocation2 + $0x48] sm:$0xff] }
  0x42   : > { %1326 = vmatprep.subr.bf16.mxu0 %v1325_v25  ;;  %v568_v53 = vld [vmem:[%s1670_s26 + $0x4] sm:$0xff]  ;;  %v194_v62 = vld [vmem:[#allocation2 + $0x40] sm:$0xff]  ;;  %v580_v1 = vld [vmem:[#allocation2 + $0x1a8] sm:$0xff]  ;;  %p1498_p7 = pnand %p1497_p4, %p1491_p12 }
  0x43   : > { %v193_v57 = vld [vmem:[#allocation2 + $0x38] sm:$0xff]  ;;  %v577_v58 = vld [vmem:[#allocation2 + $0x190] sm:$0xff]  ;;  %v579_v0 = vld [vmem:[#allocation2 + $0x1a0] sm:$0xff]  ;;  %v1289_v2 = vpack.c.bf16 %v195_v63, %v194_v62 }
  0x44   : > { %1268 = vmatpush3.bf16.msra.mxu1 %v1265_v24  ;;  %v578_v59 = vld [vmem:[#allocation2 + $0x198] sm:$0xff]  ;;  %v1285_v60 = vpack.c.bf16 %v193_v57, %v192_v56  ;;  %v1349_v3 = vpack.c.bf16 %v580_v1, %v579_v0  ;;  %v196_v4 = vld [vmem:[#allocation2 + $0x50] sm:$0xff]  ;;  %v669_v9 = vld [vmem:[#allocation2 + $0x1c0] sm:$0xff] }
  0x45   : > { %1328 = vmatpush3.bf16.msra.mxu0 %v1325_v25  ;;  %1270 = vmatprep.subr.bf16.mxu1 %v1269_v30  ;;  %v1345_v61 = vpack.c.bf16 %v578_v59, %v577_v58  ;;  %v377_v5 = vld [vmem:[#allocation2 + $0xb0] sm:$0xff]  ;;  %v378_v6 = vld [vmem:[#allocation2 + $0xb8] sm:$0xff]  ;;  %v379_v11 = vld [vmem:[#allocation2 + $0xc0] sm:$0xff] }
  0x46   : > { %1330 = vmatprep.subr.bf16.mxu0 %v1329_v31  ;;  %v581_v7 = vld [vmem:[#allocation2 + $0x1b0] sm:$0xff]  ;;  %v668_v8 = vld [vmem:[#allocation2 + $0x1b8] sm:$0xff]  ;;  %v1293_v10 = vpack.c.bf16 %v378_v6, %v377_v5  ;;  %v380_v12 = vld [vmem:[#allocation2 + $0xc8] sm:$0xff] }
  0x47   : > { %v1353_v13 = vpack.c.bf16 %v669_v9, %v668_v8  ;;  %v670_v14 = vld [vmem:[#allocation2 + $0x1c8] sm:$0xff]  ;;  %v671_v15 = vld [vmem:[#allocation2 + $0x1d0] sm:$0xff]  ;;  %v185_v16 = vld [vmem:[%s1670_s26 + $0x8] sm:$0xff]  ;;  %v1297_v18 = vpack.c.bf16 %v380_v12, %v379_v11 }
  0x48   : > { %1272 = vmatpush3.bf16.msra.mxu1 %v1269_v30  ;;  %v569_v17 = vld [vmem:[%s1670_s26 + $0xc] sm:$0xff]  ;;  %v1357_v19 = vpack.c.bf16 %v671_v15, %v670_v14  ;;  %v381_v20 = vld [vmem:[#allocation2 + $0xd0] sm:$0xff]  ;;  %v384_v29 = vld [vmem:[#allocation2 + $0xe8] sm:$0xff] }
  0x49   : > { %1332 = vmatpush3.bf16.msra.mxu0 %v1329_v31  ;;  %1098 = vmatprep.subr.mxu1 %v210_v32  ;;  %v382_v21 = vld [vmem:[#allocation2 + $0xd8] sm:$0xff]  ;;  %v673_v23 = vld [vmem:[#allocation2 + $0x1e0] sm:$0xff]  ;;  %v674_v30 = vld [vmem:[#allocation2 + $0x1e8] sm:$0xff] }
  0x4a   : > { %1173 = vmatprep.subr.mxu0 %v484_v35  ;;  %v672_v22 = vld [vmem:[#allocation2 + $0x1d8] sm:$0xff]  ;;  %v1301_v26 = vpack.c.bf16 %v382_v21, %v381_v20  ;;  %v383_v28 = vld [vmem:[#allocation2 + $0xe0] sm:$0xff]  ;;  %v675_v31 = vld [vmem:[#allocation2 + $0x1f0] sm:$0xff] }
  0x4b   : > { %v374_v24 = vld [vmem:[%s1670_s26 + $0x2] sm:$0xff]  ;;  %v1361_v27 = vpack.c.bf16 %v673_v23, %v672_v22  ;;  %v1365_v33 = vpack.c.bf16 %v675_v31, %v674_v30  ;;  %v677_v37 = vld [vmem:[#allocation2 + $0x200] sm:$0xff]  ;;  %v980_v1 = vld [vmem:[%s1755_s2] ss:$0 sm:$0xff] }
  0x4c   : > { %1099 = vmatpush3.msra.mxu1 %v210_v32  ;;  %v665_v25 = vld [vmem:[%s1670_s26 + $0x5] sm:$0xff]  ;;  %v1305_v32 = vpack.c.bf16 %v384_v29, %v383_v28  ;;  %v387_v40 = vld [vmem:[#allocation2 + $0x100] sm:$0xff] }
  0x4d   : > { %1174 = vmatpush3.msra.mxu0 %v484_v35  ;;  %1274 = vmatprep.subr.bf16.mxu1 %v1273_v38  ;;  %v385_v34 = vld [vmem:[#allocation2 + $0xf0] sm:$0xff]  ;;  %v386_v35 = vld [vmem:[#allocation2 + $0xf8] sm:$0xff] }
  0x4e   : > { %1334 = vmatprep.subr.bf16.mxu0 %v1333_v41  ;;  %1101 = vmatmul.mubr.msk.f32.vlgmr.msra.gmra.mrb[0].mxu1 %vm211_vm0, %v198_v44  ;;  %v676_v36 = vld [vmem:[#allocation2 + $0x1f8] sm:$0xff]  ;;  %v765_v42 = vld [vmem:[#allocation2 + $0x210] sm:$0xff]  ;;  %v767_v44 = vld [vmem:[#allocation2 + $0x220] sm:$0xff] }
  0x4f   : > { %1276 = vmatpush3.bf16.msra.mxu1 %v1273_v38  ;;  %1176 = vmatmul.mubr.msk.f32.vlgmr.msra.gmra.mrb[0].mxu0 %vm211_vm0, %v472_v45  ;;  %v1309_v38 = vpack.c.bf16 %v386_v35, %v385_v34  ;;  %v1369_v39 = vpack.c.bf16 %v677_v37, %v676_v36  ;;  %v766_v43 = vld [vmem:[#allocation2 + $0x218] sm:$0xff]  ;;  %v768_v45 = vld [vmem:[#allocation2 + $0x228] sm:$0xff]  ;;  %v769_v51 = vld [vmem:[#allocation2 + $0x230] sm:$0xff] }
  0x50   : > { %1336 = vmatpush3.bf16.msra.mxu0 %v1333_v41  ;;  %1278 = vmatprep.subr.bf16.mxu1 %v1277_v46  ;;  %v678_v41 = vld [vmem:[#allocation2 + $0x208] sm:$0xff]  ;;  %v666_v48 = vld [vmem:[%s1670_s26 + $0xd] sm:$0xff]  ;;  %v1377_v49 = vpack.c.bf16 %v768_v45, %v767_v44  ;;  %v773_v57 = vld [vmem:[#allocation2 + $0x250] sm:$0xff] }
  0x51   : > { %1338 = vmatprep.subr.bf16.mxu0 %v1337_v47  ;;  %1125 = vmatprep.mubr.msk.f32.mxu1 %vm211_vm0, %v184_v52  ;;  %v762_v50 = vld [vmem:[%s1670_s26 + $0x6] sm:$0xff] }
  0x52   : > { %1200 = vmatprep.mubr.msk.f32.mxu0 %vm211_vm0, %v568_v53  ;;  %v770_v52 = vld [vmem:[#allocation2 + $0x238] sm:$0xff] }
  0x53   : > { %1280 = vmatpush3.bf16.msra.mxu1 %v1277_v46  ;;  %v375_v46 = vld [vmem:[%s1670_s26 + $0xa] sm:$0xff]  ;;  %v1381_v53 = vpack.c.bf16 %v770_v52, %v769_v51 }
  0x54   : > { %1340 = vmatpush3.bf16.msra.mxu0 %v1337_v47  ;;  %1282 = vmatprep.subr.bf16.mxu1 %v1281_v54  ;;  %v1373_v47 = vpack.c.bf16 %v766_v43, %v765_v42  ;;  %v774_v58 = vld [vmem:[#allocation2 + $0x258] sm:$0xff] }
  0x55   : > { %1342 = vmatprep.subr.bf16.mxu0 %v1341_v55  ;;  %v1389_v59 = vpack.c.bf16 %v774_v58, %v773_v57 }
  0x57   : > { %1284 = vmatpush3.bf16.msra.mxu1 %v1281_v54  ;;  %v771_v54 = vld [vmem:[#allocation2 + $0x240] sm:$0xff] }
  0x58   : > { %1344 = vmatpush3.bf16.msra.mxu0 %v1341_v55  ;;  %1286 = vmatprep.subr.bf16.mxu1 %v1285_v60  ;;  %v772_v55 = vld [vmem:[#allocation2 + $0x248] sm:$0xff] }
  0x59   : > { %1346 = vmatprep.subr.bf16.mxu0 %v1345_v61  ;;  %v1385_v56 = vpack.c.bf16 %v772_v55, %v771_v54 }
  0x5b   : > { %1288 = vmatpush3.bf16.msra.mxu1 %v1285_v60  ;;  %v775_v60 = vld [vmem:[#allocation2 + $0x260] sm:$0xff] }
  0x5c   : > { %1348 = vmatpush3.bf16.msra.mxu0 %v1345_v61  ;;  %1290 = vmatprep.subr.bf16.mxu1 %v1289_v2  ;;  %v763_v61 = vld [vmem:[%s1670_s26 + $0xe] sm:$0xff] }
  0x5d   : > { %1350 = vmatprep.subr.bf16.mxu0 %v1349_v3 }
  0x5f   : > { %1292 = vmatpush3.bf16.msra.mxu1 %v1289_v2 }
  0x60   : > { %1352 = vmatpush3.bf16.msra.mxu0 %v1349_v3  ;;  %1123 = vmatprep.subr.mxu1 %v196_v4 }
  0x61   : > { %1198 = vmatprep.subr.mxu0 %v581_v7 }
  0x63   : > { %1124 = vmatpush3.msra.mxu1 %v196_v4 }
  0x64   : > { %1199 = vmatpush3.msra.mxu0 %v581_v7  ;;  %1294 = vmatprep.subr.bf16.mxu1 %v1293_v10 }
  0x65   : > { %1354 = vmatprep.subr.bf16.mxu0 %v1353_v13  ;;  %1126 = vmatmul.mubr.msk.f32.vlgmr.msra.gmra.mrb[0].mxu1 %vm211_vm0, %v185_v16 }
  0x66   : > { %1296 = vmatpush3.bf16.msra.mxu1 %v1293_v10  ;;  %1201 = vmatmul.mubr.msk.f32.vlgmr.msra.gmra.mrb[0].mxu0 %vm211_vm0, %v569_v17 }
  0x67   : > { %1356 = vmatpush3.bf16.msra.mxu0 %v1353_v13  ;;  %1298 = vmatprep.subr.bf16.mxu1 %v1297_v18 }
  0x68   : > { %1358 = vmatprep.subr.bf16.mxu0 %v1357_v19  ;;  %1150 = vmatprep.mubr.msk.f32.mxu1 %vm211_vm0, %v374_v24 }
  0x69   : > { %1225 = vmatprep.mubr.msk.f32.mxu0 %vm211_vm0, %v665_v25 }
  0x6a   : > { %1300 = vmatpush3.bf16.msra.mxu1 %v1297_v18 }
  0x6b   : > { %1360 = vmatpush3.bf16.msra.mxu0 %v1357_v19  ;;  %1302 = vmatprep.subr.bf16.mxu1 %v1301_v26 }
  0x6c   : > { %1362 = vmatprep.subr.bf16.mxu0 %v1361_v27 }
  0x6e   : > { %1304 = vmatpush3.bf16.msra.mxu1 %v1301_v26 }
  0x6f   : > { %1364 = vmatpush3.bf16.msra.mxu0 %v1361_v27  ;;  %1306 = vmatprep.subr.bf16.mxu1 %v1305_v32 }
  0x70   : > { %1366 = vmatprep.subr.bf16.mxu0 %v1365_v33 }
  0x72   : > { %1308 = vmatpush3.bf16.msra.mxu1 %v1305_v32 }
  0x73   : > { %1368 = vmatpush3.bf16.msra.mxu0 %v1365_v33  ;;  %1310 = vmatprep.subr.bf16.mxu1 %v1309_v38 }
  0x74   : > { %1370 = vmatprep.subr.bf16.mxu0 %v1369_v39 }
  0x76   : > { %1312 = vmatpush3.bf16.msra.mxu1 %v1309_v38 }
  0x77   : > { %1372 = vmatpush3.bf16.msra.mxu0 %v1369_v39  ;;  %1148 = vmatprep.subr.mxu1 %v387_v40 }
  0x78   : > { %1223 = vmatprep.subr.mxu0 %v678_v41 }
  0x7a   : > { %1149 = vmatpush3.msra.mxu1 %v387_v40 }
  0x7b   : > { %1224 = vmatpush3.msra.mxu0 %v678_v41  ;;  %1151 = vmatmul.mubr.msk.f32.vlgmr.msra.gmra.mrb[0].mxu1 %vm211_vm0, %v375_v46 }
  0x7c   : > { %1374 = vmatprep.subr.bf16.mxu0 %v1373_v47  ;;  %1226 = vmatmul.mubr.msk.f32.vlgmr.msra.gmra.mrb[0].mxu0 %vm211_vm0, %v666_v48 }
  0x7d   : > { %1376 = vmatpush3.bf16.msra.mxu0 %v1373_v47  ;;  %1250 = vmatprep.mubr.msk.f32.mxu0 %vm211_vm0, %v762_v50 }
  0x7e   : > { %1378 = vmatprep.subr.bf16.mxu0 %v1377_v49 }
  0x81   : > { %1380 = vmatpush3.bf16.msra.mxu0 %v1377_v49 }
  0x82   : > { %1382 = vmatprep.subr.bf16.mxu0 %v1381_v53 }
  0x85   : > { %1384 = vmatpush3.bf16.msra.mxu0 %v1381_v53 }
  0x86   : > { %1386 = vmatprep.subr.bf16.mxu0 %v1385_v56 }
  0x89   : > { %1388 = vmatpush3.bf16.msra.mxu0 %v1385_v56 }
  0x8a   : > { %1390 = vmatprep.subr.bf16.mxu0 %v1389_v59 }
  0x8d   : > { %1392 = vmatpush3.bf16.msra.mxu0 %v1389_v59 }
  0x8e   : > { %1248 = vmatprep.subr.mxu0 %v775_v60 }
  0x91   : > { %1249 = vmatpush3.msra.mxu0 %v775_v60 }
  0x92   : > { %1251 = vmatmul.mubr.msk.f32.vlgmr.msra.gmra.mrb[0].mxu0 %vm211_vm0, %v763_v61 }
 0x14e   : > { %v1152_v62 = vpop.f32.mrb[0].mxu1 }
 0x14f   : > { %v460_v63 = vpop.f32.mrb[1].mxu1 }
 0x165   : > { %v1252_v0 = vpop.f32.mrb[0].mxu0 }
 0x166   : > { %v1393_v2 = vadd.f32 %v1252_v0, %v1152_v62  ;;  %v848_v3 = vpop.f32.mrb[1].mxu0 }
 0x167   : > { %v1394_v4 = vadd.f32 %v848_v3, %v460_v63 }
 0x168   : > { %v867_v5 = vadd.f32 %v1393_v2, %v980_v1 }
 0x169   : > { %v866_v6 = vadd.f32 %v1394_v4, %v980_v1 }
 0x16a   : > { %869 = vst [vmem:[%s178_s4 + $0x8] sm:$0xff] %v867_v5 }
 0x16b   : > { %868 = vst [vmem:[%s178_s4] sm:$0xff] %v866_v6 }
 0x16c   : > { %1501 = shalt.err (!%p1498_p7)
}
 0x16d   : > { %s1502_s20 = scalar_lea.hbm %s1710_s9, 256  ;;  %s1506_s26 = scalar_lea.hbm %s1756_s3, 512 }
 0x16e   : > { %p1503_p8 = scmp.ne.s32.totalorder %s1710_s9, %s1502_s20  ;;  %p1507_p1 = scmp.lt.u32.totalorder %s1710_s9, %s1756_s3 }
 0x16f   : > { %p1508_p0 = scmp.lt.u32.totalorder %s1506_s26, %s1502_s20  ;;  %p1510_p6 = scmp.lt.u32.totalorder %s1502_s20, %s1710_s9 }
 0x170   : > { %p1504_p11 = pnand %p1503_p8, %p1767_p9 }
 0x171   : > { %p1509_p5 = por %p1508_p0, %p1507_p1 }
 0x172   : > { %p1505_p13 = pneg %p1504_p11 }
 0x173   : > { %p1511_p10 = por %p1510_p6, %p1509_p5 }
 0x175   : > { %p1512_p12 = pnand %p1511_p10, %p1505_p13 }
 0x177   : > { %1515 = shalt.err (!%p1512_p12)
}
 0x178   : > { %s1560_s29 = smov 128   ;;  %s1561_s30 = smov 8  }
 0x179   : > { %1410 = dma.vmem_to_hbm [thread:$0]  (%p1767_p9), %s1705_s5, 256, %s1710_s9, %s1712_s10, %s1560_s29, %s1560_s29, %s1561_s30  }
 0x17a PF: > { %p1422_p2 = scmp.ge.s32.totalorder %s1554_s15, 2  ;;  %s899_s4 = sand.u32 1, %s1542_s12  }
 0x17b   : > { %p1768_p3 = scmp.ne.s32.totalorder %s1761_s23, 0  ;;  %s900_s6 = scalar_lea.sflag [#allocation4], %s899_s4 }
 0x17d   : > { %p1417_p4 = pnand %p1422_p2, %p1768_p3 }
 0x17f   : > { %1537 = dma.done.wait (!%p1417_p4), %s900_s6, 256  }
 0x180   : > { %1539 = vsyncadd (!%p1417_p4), %s900_s6, 4294967040  ;;  %p14_p7 = scmp.ge.s32.totalorder %s1607_s18, 4   ;;  %s1769_s12 = smov %s1546_s13 }
 0x181   : > { %s1770_s13 = smov %s1550_s14  ;;  %s1771_s14 = smov %s1618_s21 }
 0x182   : > { %s1772_s15 = smov %s1607_s18  ;;  %16 = sbr.rel (!%p14_p7) target bundleno = 4 (0x4), region = 78 }
 0x189   :  { %905 = vsyncpa [#allocation3], 1 }
 0x18a   :  { %907 = vsyncpa [#allocation3 + $0x1], 1 }
 0x18b   :  { %908 = vsyncpa [#allocation4], 1 }
 0x18c   :  { %910 = vsyncpa [#allocation4 + $0x1], 1 }

</bundles_post_ra>
